<compile_context>
chip_gen: v7x
topology: tpu7x:2x2x1
jax: 0.10.0
libtpu: 0.0.40
codegen_flags: <defaults>
</compile_context>

<pallas_src>
import jax
import jax.numpy as jnp
from jax.experimental import pallas as pl
from jax.experimental.pallas import tpu as pltpu


def _cast_kernel(x_ref, o_ref):
    # Elementwise dtype conversion on the current VMEM tile.
    o_ref[...] = x_ref[...].astype(o_ref.dtype)


def _round_down(v, m):
    return (v // m) * m


def _round_up(v, m):
    return ((v + m - 1) // m) * m


# Lane-dense column widths to try (largest first); all multiples of 128.
_COL_CANDIDATES = (4096, 2048, 1024, 512, 256, 128)


def _tpu_generation_info():
    """Return (vmem_capacity_bytes, num_tensorcores) with safe fallbacks.

    Capacity only bounds the scoped-VMEM limit we request; tile sizing itself
    is decoupled from capacity (flat 8 MiB combined target), so a fallback
    here can never silently shrink tiles on v5e/v6e.
    """
    kind = ""
    try:
        kind = jax.devices()[0].device_kind.lower()
    except Exception:
        kind = ""
    is_v7 = ("v7" in kind) or ("tpu7" in kind)

    vmem = None
    try:
        vmem = int(pltpu.get_tpu_info().vmem_capacity_bytes)
    except Exception:
        vmem = None
    if vmem is None or vmem <= 0:
        # v7x: 64 MiB per TC; v5e/v6e: 128 MiB.
        vmem = (64 << 20) if is_v7 else (128 << 20)

    num_tc = 2 if is_v7 else 1
    try:
        nc = getattr(jax.devices()[0], "num_cores", None)
        if isinstance(nc, int) and nc in (1, 2):
            num_tc = nc
    except Exception:
        pass
    return vmem, num_tc


def _pick_tile_rows(rows, target_rows, align, num_tc, max_search=512):
    """Pick the tile row count.

    Priorities: (a) aligned exact divisor of `rows` near the byte-derived
    target with an even step count on 2-TC chips, (b) aligned even-step
    non-divisor on 2-TC chips, (c) aligned exact divisor, (d) the aligned
    byte-derived target.  Exact divisors avoid a short partial last block
    (masked vst.msk tail); even steps balance the two v7x TensorCores.
    """
    target_rows = _round_down(min(target_rows, rows), align)
    if target_rows <= 0:
        # rows smaller than one sublane-aligned group: full extent is legal.
        return rows
    if target_rows >= rows:
        return rows

    def balanced(tr):
        steps = pl.cdiv(rows, tr)
        return num_tc == 1 or steps == 1 or steps % 2 == 0

    best_divisor = None
    lo = max(align, target_rows // 2)
    cand = target_rows
    for _ in range(max_search):
        if cand < lo:
            break
        if rows % cand == 0:
            if balanced(cand):
                return cand                  # exact divisor, balanced steps
            if best_divisor is None:
                best_divisor = cand          # exact divisor, odd steps (2-TC)
        cand -= align

    # No balanced divisor found: nudge the byte-derived target down on 2-TC
    # chips so both TensorCores get the same number of steps.
    tr = target_rows
    for _ in range(64):
        if balanced(tr) or tr - align < align:
            break
        tr -= align
    if balanced(tr):
        return tr
    return best_divisor if best_divisor is not None else target_rows


def pallas_cast(x, dtype, *, min_pallas_bytes=256 * 1024):
    """Cast `x` to `dtype` using a Pallas TPU kernel.

    Mirrors Cast.forward: returns x unchanged if the dtype already matches;
    otherwise performs the elementwise cast on-chip.
    """
    dtype = jnp.dtype(dtype)
    if x.dtype == dtype:
        return x  # same semantics as torch's `.to(dtype)` no-op path

    in_item = jnp.dtype(x.dtype).itemsize
    out_item = dtype.itemsize
    n = int(x.size)

    # Small-tensor fast path: fixed pallas_call overhead (dispatch + DMA
    # setup) dwarfs the cast; XLA's fused convert wins here.
    if n == 0 or n * max(in_item, out_item) < min_pallas_bytes:
        return x.astype(dtype)

    # Re-flatten to a fully lane-dense 2-D slab. A cast is elementwise, so
    # layout is irrelevant; pick the largest candidate column width that
    # divides the element count exactly (no padding -> no pad-leak risk).
    cols = None
    for c in _COL_CANDIDATES:
        if n % c == 0:
            cols = c
            break
    if cols is None:
        # Element count not a multiple of 128: padding would cost an extra
        # full HBM pass, so let XLA's convert handle this rare shape.
        return x.astype(dtype)

    rows = n // cols
    x2d = x.reshape(rows, cols)

    vmem_bytes, num_tc = _tpu_generation_info()

    # --- tile sizing --------------------------------------------------------
    # Flat ~8 MiB combined (in + out) per grid step on every generation.
    target_tile_bytes = 8 << 20

    # Sublane alignment of the *narrower* dtype in the pair:
    # 8 for 4-byte, 16 for 2-byte, 32 for 1-byte elements.
    align = 32 // min(in_item, out_item)

    bytes_per_row = cols * (in_item + out_item)
    tr_target = max(1, target_tile_bytes // bytes_per_row)

    # Enough grid steps to shard across both v7x TensorCores (8) or just keep
    # read/compute/writeback overlapped on single-TC v5e/v6e (4).
    min_steps = 8 if num_tc == 2 else 4
    if rows >= min_steps * align:
        tr_target = min(tr_target, _round_up(pl.cdiv(rows, min_steps), align))

    tr = _pick_tile_rows(rows, tr_target, align, num_tc)
    num_steps = pl.cdiv(rows, tr)
    grid = (num_steps,)

    # Deeper input prefetch chain: the kernel has ~zero compute, so any DMA
    # issue latency or step-boundary bubble is directly exposed; a third
    # input buffer is cheap in VMEM.  Only worth it with >= 3 steps.
    if num_steps >= 3:
        in_spec = pl.BlockSpec((tr, cols), lambda i: (i, 0),
                               pipeline_mode=pl.Buffered(3))
    else:
        in_spec = pl.BlockSpec((tr, cols), lambda i: (i, 0))
    out_spec = pl.BlockSpec((tr, cols), lambda i: (i, 0))

    out2d = pl.pallas_call(
        _cast_kernel,
        out_shape=jax.ShapeDtypeStruct((rows, cols), dtype),
        grid_spec=pltpu.PrefetchScalarGridSpec(
            num_scalar_prefetch=0,
            grid=grid,
            in_specs=[in_spec],
            out_specs=out_spec,
        ),
        compiler_params=pltpu.CompilerParams(
            # "parallel" lets the grid shard across both v7x TensorCores;
            # _pick_tile_rows keeps the step count even there so both TCs
            # get equal rows.  On 1-TC chips it's a plain sequential loop.
            dimension_semantics=("parallel",),
            # Raise the scoped VMEM limit above the v5e/v6e defaults
            # (16/32 MiB) so the 3x-in + 2x-out buffered ~8 MiB-combined
            # tiles (~22 MiB worst case) fit; cap at half of physical VMEM
            # (32 MiB on v7x, 64 MiB on v5e/v6e).
            vmem_limit_bytes=int(min(vmem_bytes // 2, 64 << 20)),
        ),
    )(x2d)

    return out2d.reshape(x.shape)


class Cast:
    """JAX/Pallas equivalent of the PyTorch Cast module."""

    def __init__(self, dtype):
        self._dtype = jnp.dtype(dtype)

    def __call__(self, x):
        return pallas_cast(x, self._dtype)


if __name__ == "__main__":
    key = jax.random.PRNGKey(0)

    # 1) Embedding-like input [seq=8, batch=2, hidden=32], f32 -> bf16.
    #    Force the Pallas path (min_pallas_bytes=0) so the kernel itself runs
    #    even at this tiny size.
    x_small = jax.random.normal(key, (8, 2, 32), dtype=jnp.float32)
    y_small = pallas_cast(x_small, jnp.bfloat16, min_pallas_bytes=0)
    jax.block_until_ready(y_small)
    assert y_small.dtype == jnp.bfloat16
    assert y_small.shape == x_small.shape
    assert jnp.array_equal(y_small, x_small.astype(jnp.bfloat16))

    # 2) Activation-like input crossing the Pallas threshold naturally:
    #    [seq=8, batch=64, hidden=256] f32 (512 KiB) -> bf16.
    k1, _ = jax.random.split(key)
    x_big = jax.random.normal(k1, (8, 64, 256), dtype=jnp.float32)
    cast = Cast(jnp.bfloat16)
    y_big = cast(x_big)
    jax.block_until_ready(y_big)
    assert y_big.dtype == jnp.bfloat16
    assert y_big.shape == x_big.shape
    assert jnp.array_equal(y_big, x_big.astype(jnp.bfloat16))

    # 3) Identity path (already correct dtype) returns the same tensor.
    z = cast(y_big)
    jax.block_until_ready(z)
    assert z.dtype == jnp.bfloat16
    assert z is y_big

    # 4) Irregular total size (not a multiple of 128) takes the XLA fallback.
    x_odd = jax.random.normal(key, (7, 5, 3), dtype=jnp.float32)
    y_odd = pallas_cast(x_odd, jnp.float16, min_pallas_bytes=0)
    jax.block_until_ready(y_odd)
    assert jnp.array_equal(y_odd, x_odd.astype(jnp.float16))

    print("KERNEL_OK")
</pallas_src>

<mosaic_0001>
module attributes {stable_mosaic.version = 11 : i64} {
  func.func @_cast_kernel(%arg0: i32, %arg1: memref<1x512xf32, #tpu.memory_space<vmem>>, %arg2: memref<1x512xbf16, #tpu.memory_space<vmem>>) attributes {dimension_semantics = [#tpu.dimension_semantics<parallel>], iteration_bounds = array<i64: 1>, scalar_prefetch = 0 : i64, scratch_operands = 0 : i64, tpu.core_type = #tpu.core_type<tc>, window_params = [{transform_indices = @transform_0, window_bounds = array<i64: 1, 512>}, {transform_indices = @transform_1, window_bounds = array<i64: 1, 512>}]} {
    %c0 = arith.constant 0 : index
    %c0_0 = arith.constant 0 : index
    %0 = vector.load %arg1[%c0, %c0_0] : memref<1x512xf32, #tpu.memory_space<vmem>>, vector<1x512xf32>
    %1 = arith.truncf %0 : vector<1x512xf32> to vector<1x512xbf16>
    %c0_1 = arith.constant 0 : index
    %c0_2 = arith.constant 0 : index
    %2 = vector.load %arg2[%c0_1, %c0_2] : memref<1x512xbf16, #tpu.memory_space<vmem>>, vector<1x512xbf16>
    tpu.vector_store %arg2[%c0_1, %c0_2], %1 {strides = array<i32>} : memref<1x512xbf16, #tpu.memory_space<vmem>>, vector<1x512xbf16>,
    return
  }
  func.func @transform_0(%arg0: i32) -> (i32, i32) {
    %c0_i32 = arith.constant 0 : i32
    %c0_i32_0 = arith.constant 0 : i32
    return %arg0, %c0_i32 : i32, i32
  }
  func.func @transform_1(%arg0: i32) -> (i32, i32) {
    %c0_i32 = arith.constant 0 : i32
    %c0_i32_0 = arith.constant 0 : i32
    return %arg0, %c0_i32 : i32, i32
  }
}

</mosaic_0001>

<bundles_post_ra>
// kernel: tpu_custom_call.1
= control target key start
LH: loop header
LB: loop body
LE: loop exit
PB: predicated region body
PF: predicated region fallthrough
CT: control target
= control target key end

     0   :  { %6 = vsyncpa [#allocation3], 0  ;;  %s211_s0 = inlined_call_operand.hbm [shape: f32[1,512], index: 0, kind: input, shape index: {}]   ;;  %s212_s1 = inlined_call_operand.hbm [shape: bf16[1,512], index: 1, kind: output, shape index: {}]  }
   0x1   :  { %7 = vsyncpa [#allocation4], 0  ;;  %s162_s6 = smov [#allocation2]   ;;  %s114_s10 = scalar_lea.hbm %s211_s0, 64 }
   0x2   :  { %s14_s7 = sshll.u32 %s162_s6, 4  ;;  %p115_p0 = scmp.ne.s32.totalorder %s211_s0, %s114_s10  ;;  %s15_s7 = int_to_ptr.vmem [resolvable:$true] %s14_s7 }
   0x3   :  { %p118_p1 = scmp.lt.u32.totalorder %s114_s10, %s211_s0 }
   0x5   :  { %p120_p2 = pnand %p118_p1, %p115_p0 }
   0x7   :  { %123 = shalt.err (!%p120_p2)
}
   0x8   :  { %s124_s15 = scalar_lea.vmem %s15_s7, 64  ;;  %p129_p4 = scmp.lt.s32.totalorder %s15_s7, %s15_s7 }
   0x9   :  { %p125_p3 = scmp.ne.s32.totalorder %s15_s7, %s124_s15  ;;  %p130_p5 = scmp.lt.s32.totalorder %s124_s15, %s124_s15 }
   0xb   :  { %p131_p6 = por %p130_p5, %p129_p4 }
   0xd   :  { %p132_p7 = pnand %p131_p6, %p125_p3 }
   0xf   :  { %135 = shalt.err (!%p132_p7)
}
  0x10   :  { %17 = dma.hbm_to_vmem [thread:$0]  %s211_s0, 64, %s15_s7, [#allocation3]  }
  0x11   :  { %158 = dma.done.wait [#allocation3], 64  }
  0x12   :  { %159 = vsyncadd [#allocation3], 4294967232  ;;  %v23_v0 = vlaneseq  ;;  %vm76_vm0 = vcmask 1040384   ;;  %v163_v1 = vmov 1966171168   ;;  %vm79_vm2 = vcmask 1041409  }
  0x13   :  { %v54_v2 = vunpack.c.l.s4 %v163_v1  ;;  %vm77_vm1 = vsmask.f32 256  ;;  %vm80_vm3 = vsmask.f32 1280  ;;  %vm83_vm6 = vcmask 1042434   ;;  %s164_s0 = smov [#allocation5]  }
  0x14   :  { %v24_v3 = vshrl.u32 %v23_v0, 7  ;;  %vm187_vm4 = vmand %vm76_vm0, %vm77_vm1  ;;  %vm84_vm7 = vsmask.f32 2304  ;;  %v21_v11 = vld [vmem:[#allocation2] sm:$0xf]  ;;  %vm87_vm10 = vcmask 1043459  }
  0x15   :  { %v55_v4 = vunpack.c.0.s8 %v54_v2  ;;  %vm191_vm5 = vmand %vm79_vm2, %vm80_vm3  ;;  %vm88_vm11 = vsmask.f32 3328  ;;  %s100_s18 = sshll.u32 %s164_s0, 4  ;;  %v91_v22 = vld [vmem:[#allocation5] sm:$0xf]  ;;  %s101_s18 = int_to_ptr.vmem [resolvable:$true] %s100_s18 }
  0x16   :  { %v25_v6 = vsub.s32 0, %v24_v3  ;;  %v29_v7 = vsub.s32 1, %v24_v3  ;;  %v33_v8 = vsub.s32 2, %v24_v3  ;;  %v37_v9 = vsub.s32 3, %v24_v3  ;;  %vm82_vm8 = vmor %vm191_vm5, %vm187_vm4  ;;  %s136_s19 = scalar_lea.vmem %s101_s18, 64  ;;  %p141_p9 = scmp.lt.s32.totalorder %s101_s18, %s101_s18 }
  0x17   :  { %v58_v12 = vsub.s32 %v55_v4, %v24_v3  ;;  %vm85_vm9 = vmand %vm83_vm6, %vm84_vm7  ;;  %p137_p8 = scmp.ne.s32.totalorder %s101_s18, %s136_s19  ;;  %p142_p10 = scmp.lt.s32.totalorder %s136_s19, %s136_s19 }
  0x18   :  { %v26_v13 = vrot.slane %v21_v11, %v25_v6  ;;  %v30_v14 = vrot.slane %v21_v11, %v29_v7  ;;  %v34_v15 = vrot.slane %v21_v11, %v33_v8  ;;  %v38_v16 = vrot.slane %v21_v11, %v37_v9  ;;  %vm86_vm12 = vmor %vm85_vm9, %vm82_vm8 }
  0x19   :  { %vm89_vm13 = vmand %vm87_vm10, %vm88_vm11  ;;  %p143_p11 = por %p142_p10, %p141_p9 }
  0x1a   :  { %v109_v17 = vpack.c.bf16 %v30_v14, %v26_v13  ;;  %v110_v18 = vpack.c.bf16 %v38_v16, %v34_v15  ;;  %vm90_vm14 = vmor %vm89_vm13, %vm86_vm12 }
  0x1b   :  { %p144_p12 = pnand %p143_p11, %p137_p8 }
  0x1c   :  { %v59_v19 = vrot.slane %v109_v17, %v58_v12  ;;  %v66_v20 = vrot.slane %v110_v18, %v58_v12 }
  0x1e   :  { %v67_v21 = vcombine.low %v59_v19, %v66_v20 }
  0x20   :  { %v74_v23 = vrot.slane %v67_v21, %v58_v12 }
  0x22   :  { %v92_v24 = vsel %vm90_vm14, %v74_v23, %v91_v22 }
  0x23   :  { %93 = vst [vmem:[#allocation5] sm:$0xf] %v92_v24 }
  0x24   :  { %147 = shalt.err (!%p144_p12)
}
  0x25   :  { %s148_s22 = scalar_lea.hbm %s212_s1, 64 }
  0x26   :  { %p149_p13 = scmp.ne.s32.totalorder %s212_s1, %s148_s22  ;;  %p152_p0 = scmp.lt.u32.totalorder %s148_s22, %s212_s1 }
  0x28   :  { %p154_p1 = pnand %p152_p0, %p149_p13 }
  0x2a   :  { %157 = shalt.err (!%p154_p1)
}
  0x2b   :  { %103 = dma.vmem_to_hbm [thread:$0]  %s101_s18, 64, %s212_s1, [#allocation4]  }
  0x2c   :  { %160 = dma.done.wait [#allocation4], 64  }
  0x2d   :  { %161 = vsyncadd [#allocation4], 4294967232 }
  0x2e   :  { %107 = vsyncpa [#allocation3], 1 }
  0x2f   :  { %108 = vsyncpa [#allocation4], 1 }

</bundles_post_ra>
